<compile_context>
chip_gen: v6e
topology: v6e:2x2x1
jax: 0.10.0
libtpu: 0.0.40
codegen_flags: <defaults>
</compile_context>

<pallas_src>
import math

import jax
import jax.numpy as jnp
from jax.experimental import pallas as pl
from jax.experimental.pallas import tpu as pltpu


def _round_up(n, m):
    return ((n + m - 1) // m) * m


# x[.., K] . w[out, K] -> [.., out]  (contract last dims, no transpose)
_CONTRACT_LAST = (((1,), (1,)), ((), ()))


def _lora_eval_kernel(x_ref, w1_ref, w2_ref, o_ref):
    # h = x @ W1^T  -> [tile_m, r]   (f32 accumulation on the MXU)
    h = jax.lax.dot_general(x_ref[...], w1_ref[...], _CONTRACT_LAST,
                            preferred_element_type=jnp.float32)
    # eval-mode dropout is the identity
    # y = h @ W2^T  -> [tile_m, out_dim]
    y = jax.lax.dot_general(h.astype(w2_ref.dtype), w2_ref[...], _CONTRACT_LAST,
                            preferred_element_type=jnp.float32)
    o_ref[...] = y.astype(o_ref.dtype)


def _lora_train_kernel(x_ref, w1_ref, w2_ref, mask_ref, o_ref):
    # h = x @ W1^T  -> [tile_m, r]
    h = jax.lax.dot_general(x_ref[...], w1_ref[...], _CONTRACT_LAST,
                            preferred_element_type=jnp.float32)
    # inverted dropout: mask already holds 0 or 1/(1-p), one VPU multiply.
    h = h * mask_ref[...]
    # y = h @ W2^T  -> [tile_m, out_dim]
    y = jax.lax.dot_general(h.astype(w2_ref.dtype), w2_ref[...], _CONTRACT_LAST,
                            preferred_element_type=jnp.float32)
    o_ref[...] = y.astype(o_ref.dtype)


def _choose_tile_m(m, in_dim, out_dim, itemsize):
    # Double-buffered x and y tiles: 2 bufs * 2 arrays * tile_m * (in+out) * itemsize.
    # Budget ~8 MiB so we stay well inside every generation's scoped-VMEM default
    # (16 MiB on v5e) while still being large enough to sit near the HBM roofline.
    budget = 8 * 1024 * 1024
    tile = budget // (4 * (in_dim + out_dim) * itemsize)
    tile = max(8, min(1024, (tile // 8) * 8))
    tile = min(tile, _round_up(m, 8))
    return tile


def lora_forward(x, w1, w2, *, dropout_p=0.0, training=False,
                 dropout_mask=None, rng_key=None, compute_dtype=None):
    """LoRA forward pass.

    x: [..., in_dim]; w1: [r, in_dim]; w2: [out_dim, r] (PyTorch nn.Linear layout).
    In training mode with dropout_p > 0, an inverted-dropout mask is applied to
    the low-rank activation (same semantics as nn.Dropout). The mask can be
    supplied explicitly (`dropout_mask`, boolean keep-mask of shape [M, r]) or
    generated from `rng_key`.
    `compute_dtype=jnp.bfloat16` halves HBM traffic for x/weights (f32 accumulation kept).
    """
    in_dim = x.shape[-1]
    lead = x.shape[:-1]
    m = int(math.prod(lead)) if lead else 1
    r = w1.shape[0]
    out_dim = w2.shape[0]
    out_dtype = x.dtype

    x2 = x.reshape(m, in_dim)
    if compute_dtype is not None:
        x2 = x2.astype(compute_dtype)
        w1 = w1.astype(compute_dtype)
        w2 = w2.astype(compute_dtype)

    itemsize = jnp.dtype(x2.dtype).itemsize
    tile_m = _choose_tile_m(m, in_dim, out_dim, itemsize)
    m_pad = _round_up(m, tile_m)
    if m_pad != m:
        x2 = jnp.pad(x2, ((0, m_pad - m), (0, 0)))
    grid = (m_pad // tile_m,)

    inputs = [x2, w1, w2]
    in_specs = [
        pl.BlockSpec((tile_m, in_dim), lambda i: (i, 0)),     # row tile of x
        pl.BlockSpec((r, in_dim), lambda i: (0, 0)),          # w1: grid-invariant
        pl.BlockSpec((out_dim, r), lambda i: (0, 0)),         # w2: grid-invariant
    ]
    kernel = _lora_eval_kernel
    bytes_accessed = itemsize * (m_pad * (in_dim + out_dim) + r * in_dim + out_dim * r)

    if training and dropout_p > 0.0:
        # TODO(synk): generate the dropout mask on-chip with pltpu.prng_seed /
        # pltpu.prng_random_bits once those primitives lower in this environment
        # (no interpret-mode rule today); here the Bernoulli(1-p)/(1-p) mask is
        # precomputed JAX-side and streamed in per row tile.
        if dropout_mask is None:
            if rng_key is None:
                raise ValueError("training-mode dropout needs `dropout_mask` or `rng_key`")
            keep = jax.random.bernoulli(rng_key, 1.0 - dropout_p, (m, r))
        else:
            keep = jnp.asarray(dropout_mask).reshape(m, r)
        mask = keep.astype(jnp.float32) * jnp.float32(1.0 / (1.0 - dropout_p))
        if m_pad != m:
            mask = jnp.pad(mask, ((0, m_pad - m), (0, 0)))
        inputs.append(mask)
        in_specs.append(pl.BlockSpec((tile_m, r), lambda i: (i, 0)))
        kernel = _lora_train_kernel
        bytes_accessed += 4 * m_pad * r

    flops = 2 * m_pad * in_dim * r + 2 * m_pad * r * out_dim
    y = pl.pallas_call(
        kernel,
        out_shape=jax.ShapeDtypeStruct((m_pad, out_dim), out_dtype),
        grid=grid,
        in_specs=in_specs,
        out_specs=pl.BlockSpec((tile_m, out_dim), lambda i: (i, 0)),
        compiler_params=pltpu.CompilerParams(
            dimension_semantics=("parallel",),        # lets v7x shard row tiles over 2 TCs
            vmem_limit_bytes=32 * 1024 * 1024,
        ),
        cost_estimate=pl.CostEstimate(
            flops=int(flops), transcendentals=0, bytes_accessed=int(bytes_accessed)),
    )(*inputs)

    if m_pad != m:
        y = y[:m]
    return y.reshape(*lead, out_dim)


if __name__ == "__main__":
    # Small shapes consistent with the module: r=8, input_dim=32, output_dim=32
    batch, seq, input_dim, r, output_dim = 2, 8, 32, 8, 32
    dropout_p = 0.1  # matches nn.Dropout(dropout); applied only in training mode

    key = jax.random.PRNGKey(0)
    kx, k1, k2, kd = jax.random.split(key, 4)
    x = jax.random.normal(kx, (batch, seq, input_dim), dtype=jnp.float32)
    # Deterministic parameter init (nn.Linear-like uniform fan-in scaling).
    w1 = jax.random.uniform(k1, (r, input_dim), jnp.float32,
                            minval=-1.0 / input_dim ** 0.5,
                            maxval=1.0 / input_dim ** 0.5)
    w2 = jax.random.uniform(k2, (output_dim, r), jnp.float32,
                            minval=-1.0 / r ** 0.5,
                            maxval=1.0 / r ** 0.5)

    # Eval-mode forward (dropout == identity), same as PyTorch model.eval().
    y = lora_forward(x, w1, w2, dropout_p=dropout_p, training=False)
    y = jax.block_until_ready(y)
    y_ref = (x.reshape(-1, input_dim) @ w1.T @ w2.T).reshape(batch, seq, output_dim)
    assert jnp.allclose(y, y_ref, atol=1e-5, rtol=1e-5)

    # Train-mode forward with an explicit Bernoulli(1-p) keep-mask on the
    # low-rank activation (inverted-dropout semantics of nn.Dropout; the exact
    # PyTorch RNG stream is not reproduced).
    keep = jax.random.bernoulli(kd, 1.0 - dropout_p, (batch * seq, r))
    y_tr = lora_forward(x, w1, w2, dropout_p=dropout_p, training=True,
                        dropout_mask=keep)
    y_tr = jax.block_until_ready(y_tr)
    h_ref = (x.reshape(-1, input_dim) @ w1.T) * keep.astype(jnp.float32) / (1.0 - dropout_p)
    y_tr_ref = (h_ref @ w2.T).reshape(batch, seq, output_dim)
    assert jnp.allclose(y_tr, y_tr_ref, atol=1e-5, rtol=1e-5)

    print("KERNEL_OK")
</pallas_src>

<mosaic_0001>
module attributes {stable_mosaic.version = 11 : i64} {
  func.func @_lora_eval_kernel(%arg0: i32, %arg1: memref<16x32xf32, #tpu.memory_space<vmem>>, %arg2: memref<8x32xf32, #tpu.memory_space<vmem>>, %arg3: memref<32x8xf32, #tpu.memory_space<vmem>>, %arg4: memref<16x32xf32, #tpu.memory_space<vmem>>) attributes {dimension_semantics = [#tpu.dimension_semantics<parallel>], iteration_bounds = array<i64: 1>, scalar_prefetch = 0 : i64, scratch_operands = 0 : i64, tpu.core_type = #tpu.core_type<tc>, window_params = [{transform_indices = @transform_0, window_bounds = array<i64: 16, 32>}, {pipeline_mode = #tpu.pipeline_mode<synchronous>, transform_indices = @transform_1, window_bounds = array<i64: 8, 32>}, {pipeline_mode = #tpu.pipeline_mode<synchronous>, transform_indices = @transform_2, window_bounds = array<i64: 32, 8>}, {transform_indices = @transform_3, window_bounds = array<i64: 16, 32>}]} {
    %c0 = arith.constant 0 : index
    %c0_0 = arith.constant 0 : index
    %0 = vector.load %arg1[%c0, %c0_0] : memref<16x32xf32, #tpu.memory_space<vmem>>, vector<16x32xf32>
    %c0_1 = arith.constant 0 : index
    %c0_2 = arith.constant 0 : index
    %1 = vector.load %arg2[%c0_1, %c0_2] : memref<8x32xf32, #tpu.memory_space<vmem>>, vector<8x32xf32>
    %cst = arith.constant dense<0.000000e+00> : vector<16x8xf32>
    %2 = tpu.matmul %0, %1, %cst {dimension_numbers = #tpu.dot_dimension_numbers<[1], [1], [0], [0], [0, 0, 1, 0], [], []>} : vector<16x32xf32>, vector<8x32xf32>, vector<16x8xf32> -> vector<16x8xf32>
    %c0_3 = arith.constant 0 : index
    %c0_4 = arith.constant 0 : index
    %3 = vector.load %arg3[%c0_3, %c0_4] : memref<32x8xf32, #tpu.memory_space<vmem>>, vector<32x8xf32>
    %cst_5 = arith.constant dense<0.000000e+00> : vector<16x32xf32>
    %4 = tpu.matmul %2, %3, %cst_5 {dimension_numbers = #tpu.dot_dimension_numbers<[1], [1], [0], [0], [0, 0, 1, 0], [], []>} : vector<16x8xf32>, vector<32x8xf32>, vector<16x32xf32> -> vector<16x32xf32>
    %c0_6 = arith.constant 0 : index
    %c0_7 = arith.constant 0 : index
    %5 = vector.load %arg4[%c0_6, %c0_7] : memref<16x32xf32, #tpu.memory_space<vmem>>, vector<16x32xf32>
    tpu.vector_store %arg4[%c0_6, %c0_7], %4 {strides = array<i32>} : memref<16x32xf32, #tpu.memory_space<vmem>>, vector<16x32xf32>,
    return
  }
  func.func @transform_0(%arg0: i32) -> (i32, i32) {
    %c0_i32 = arith.constant 0 : i32
    %c0_i32_0 = arith.constant 0 : i32
    return %arg0, %c0_i32 : i32, i32
  }
  func.func @transform_1(%arg0: i32) -> (i32, i32) {
    %c0_i32 = arith.constant 0 : i32
    %c0_i32_0 = arith.constant 0 : i32
    %c0_i32_1 = arith.constant 0 : i32
    return %c0_i32, %c0_i32_0 : i32, i32
  }
  func.func @transform_2(%arg0: i32) -> (i32, i32) {
    %c0_i32 = arith.constant 0 : i32
    %c0_i32_0 = arith.constant 0 : i32
    %c0_i32_1 = arith.constant 0 : i32
    return %c0_i32, %c0_i32_0 : i32, i32
  }
  func.func @transform_3(%arg0: i32) -> (i32, i32) {
    %c0_i32 = arith.constant 0 : i32
    %c0_i32_0 = arith.constant 0 : i32
    return %arg0, %c0_i32 : i32, i32
  }
}

</mosaic_0001>

<bundles_post_ra>
// kernel: tpu_custom_call.1
= control target key start
LH: loop header
LB: loop body
LE: loop exit
PB: predicated region body
PF: predicated region fallthrough
CT: control target
= control target key end

     0   :  { %vm18_vm0 = vcmask 261120   ;;  %vm107_vm1 = vcmask 64512   ;;  %s341_s0 = inlined_call_operand.vmem [shape: f32[16,32], index: 0, kind: input, shape index: {}]   ;;  %s342_s1 = inlined_call_operand.vmem [shape: f32[8,32], index: 1, kind: input, shape index: {}]   ;;  %s343_s2 = inlined_call_operand.vmem [shape: f32[32,8], index: 2, kind: input, shape index: {}]   ;;  %s344_s3 = inlined_call_operand.hbm [shape: f32[16,32], index: 3, kind: output, shape index: {}]  }
   0x1   :  { %v17_v0 = vld [vmem:[%s342_s1] sm:$0xff]  ;;  %v106_v2 = vld [vmem:[%s343_s2 + $0x18] sm:$0xff]  ;;  %v105_v3 = vld [vmem:[%s343_s2 + $0x10] sm:$0xff] }
   0x2   :  { %v15_v1 = vld [vmem:[%s341_s0] sm:$0xff]  ;;  %237 = vmatprep.subr.msk.mxu0 %vm18_vm0, %v17_v0  ;;  %v16_v4 = vld [vmem:[%s341_s0 + $0x8] sm:$0xff]  ;;  %242 = vmatprep.subr.msk.mxu1 %vm107_vm1, %v106_v2 }
   0x3   :  { %239 = vmatprep.mubr.msk.f32.mxu0 %vm18_vm0, %v15_v1  ;;  %238 = vmatpush3.xpose.msk.msra.mxu0 %vm18_vm0, %v17_v0 }
   0x4   :  { %8 = vsyncpa [#allocation3], 0  ;;  %243 = vmatpush3.xpose.msk.msra.mxu1 %vm107_vm1, %v106_v2  ;;  %v104_v5 = vld [vmem:[%s343_s2 + $0x8] sm:$0xff]  ;;  %v103_v6 = vld [vmem:[%s343_s2] sm:$0xff]  ;;  %s278_s24 = smov [#allocation2]  }
   0x5   :  { %244 = vmatprep.subr.msk.mxu1 %vm107_vm1, %v105_v3  ;;  %s208_s25 = sshll.u32 %s278_s24, 4  ;;  %s209_s25 = int_to_ptr.vmem [resolvable:$true] %s208_s25 }
   0x6   :  { %240 = vmatmul.mubr.msk.f32.vlgmr.msra.gmra.mxu0 %vm18_vm0, %v16_v4  ;;  %s256_s2 = scalar_lea.vmem %s209_s25, 256  ;;  %p261_p1 = scmp.lt.s32.totalorder %s209_s25, %s209_s25 }
   0x7   :  { %p257_p0 = scmp.ne.s32.totalorder %s209_s25, %s256_s2  ;;  %p262_p2 = scmp.lt.s32.totalorder %s256_s2, %s256_s2 }
   0x8   :  { %245 = vmatpush3.xpose.msk.msra.mxu1 %vm107_vm1, %v105_v3 }
   0x9   :  { %246 = vmatprep.subr.msk.mxu1 %vm107_vm1, %v104_v5  ;;  %p263_p3 = por %p262_p2, %p261_p1 }
   0xb   :  { %p264_p4 = pnand %p263_p3, %p257_p0 }
   0xc   :  { %247 = vmatpush3.xpose.msk.msra.mxu1 %vm107_vm1, %v104_v5 }
   0xd   :  { %248 = vmatprep.subr.msk.mxu1 %vm107_vm1, %v103_v6 }
  0x10   :  { %249 = vmatpush3.xpose.msk.msra.mxu1 %vm107_vm1, %v103_v6 }
  0xc6   :  { %v241_v7 = vpop.f32.mrf.mxu0 }
  0xc8   :  { %v94_v8 = vpop.f32.mrf.mxu0 }
  0xc9   :  { %250 = vmatprep.mubr.msk.f32.mxu1 %vm107_vm1, %v94_v8 }
  0xca   :  { %251 = vmatmul.mubr.msk.f32.vlgmr.msra.gmra.mxu1 %vm107_vm1, %v241_v7 }
 0x18a   :  { %v252_v9 = vpop.f32.mrf.mxu1 }
 0x18b   :  { %202 = vst.msk [vmem:[#allocation2 + $0x8] sm:$0xff] %vm18_vm0, %v252_v9 }
 0x18c   :  { %v192_v10 = vpop.f32.mrf.mxu1 }
 0x18d   :  { %201 = vst.msk [vmem:[#allocation2] sm:$0xff] %vm18_vm0, %v192_v10 }
 0x18e   :  { %267 = shalt.err (!%p264_p4)
}
 0x18f   :  { %s279_s26 = smov 128   ;;  %s280_s27 = smov 8  }
 0x190   :  { %214 = dma.vmem_to_hbm [thread:$0]  %s209_s25, 256, %s344_s3, [#allocation3], %s279_s26, %s279_s26, %s280_s27  }
 0x191   :  { %276 = dma.done.wait [#allocation3], 256  }
 0x192   :  { %277 = vsyncadd [#allocation3], 4294967040 }
 0x193   :  { %218 = vsyncpa [#allocation3], 1 }

</bundles_post_ra>
